<compile_context>
chip_gen: v7x
topology: tpu7x:2x2x1
jax: 0.10.0
libtpu: 0.0.40
codegen_flags: <defaults>
</compile_context>

<pallas_src>
import jax
import jax.numpy as jnp
from jax.experimental import pallas as pl
from jax.experimental.pallas import tpu as pltpu

D_IN = 512
D_HID = 512
D_OUT = 2
D_OUT_PAD = 128  # lane-dense output width (multiple of 128)


def mlp_kernel(x_ref, w1_ref, b1_ref, w2_ref, b2_ref, o_ref):
    # x_ref:  (TB, 512)  f32   (cast to bf16 in-kernel)
    # w1_ref: (512, 512) bf16      b1_ref: (1, 512) f32
    # w2_ref: (512, 128) bf16      b2_ref: (1, 128) f32  (cols >= 2 are zero)
    # o_ref:  (TB, 128)  bf16
    x = x_ref[...].astype(jnp.bfloat16)          # in-kernel cast (VPU, hidden)
    h = jnp.dot(x, w1_ref[...], preferred_element_type=jnp.float32)
    h = jnp.maximum(h + b1_ref[...], 0.0)        # bias + ReLU on f32 accumulator
    # Dropout(p=0.2) in eval mode == identity.
    h = h.astype(jnp.bfloat16)                   # back to bf16 for second MXU pass
    y = jnp.dot(h, w2_ref[...], preferred_element_type=jnp.float32)
    o_ref[...] = (y + b2_ref[...]).astype(o_ref.dtype)


def prepare_params(w1, b1, w2, b2):
    """One-time parameter prep (hoisted out of the per-call forward path)."""
    w1_bf = w1.astype(jnp.bfloat16)
    b1_f32 = b1.astype(jnp.float32).reshape(1, D_HID)
    # Pad the 2-wide output projection to 128 lanes (zeros) -> dense stores.
    w2_pad = jnp.zeros((D_HID, D_OUT_PAD), jnp.bfloat16)
    w2_pad = w2_pad.at[:, :D_OUT].set(w2.astype(jnp.bfloat16))
    b2_pad = jnp.zeros((1, D_OUT_PAD), jnp.float32)
    b2_pad = b2_pad.at[:, :D_OUT].set(b2.astype(jnp.float32).reshape(1, D_OUT))
    return w1_bf, b1_f32, w2_pad, b2_pad


def _round_up(x, m):
    return ((x + m - 1) // m) * m


def _choose_tile_b(B, max_tile=1024):
    if B <= 256:
        return _round_up(B, 8)
    # Aim for >= 2 grid steps (both TensorCores on v7x) with tiles that are
    # multiples of 256 (full MXU M), capped to keep VMEM footprint modest.
    return min(max_tile, _round_up(pl.cdiv(B, 2), 256))


def trained_forward(x, w1_bf, b1_f32, w2_pad, b2_pad):
    B = x.shape[0]
    out_dtype = x.dtype

    tile_b = _choose_tile_b(B)
    if B <= 256 and B % 8 != 0:
        # Tiny-batch path only: pad a handful of rows so the single block
        # equals the (8-aligned) full array.
        x = jnp.pad(x, ((0, tile_b - B), (0, 0)))
    B_arr = x.shape[0]
    n_tiles = pl.cdiv(B_arr, tile_b)
    # For B > 256 the last block may be partial; Pallas edge-block handling
    # discards out-of-range output rows, and rows are independent, so no
    # explicit jnp.pad pass over x is needed.

    cost = pl.CostEstimate(
        flops=2 * B_arr * D_IN * (D_HID + D_OUT_PAD),
        transcendentals=0,
        bytes_accessed=(B_arr * D_IN * x.dtype.itemsize          # x
                        + D_IN * D_HID * 2 + D_HID * D_OUT_PAD * 2   # bf16 weights
                        + D_HID * 4 + D_OUT_PAD * 4                  # f32 biases
                        + B_arr * D_OUT_PAD * 2),                    # bf16 output
    )

    out_padded = pl.pallas_call(
        mlp_kernel,
        out_shape=jax.ShapeDtypeStruct((B_arr, D_OUT_PAD), jnp.bfloat16),
        grid_spec=pl.GridSpec(
            grid=(n_tiles,),
            in_specs=[
                pl.BlockSpec((tile_b, D_IN), lambda i: (i, 0)),       # x tile
                pl.BlockSpec((D_IN, D_HID), lambda i: (0, 0)),        # W1 (resident)
                pl.BlockSpec((1, D_HID), lambda i: (0, 0)),           # b1
                pl.BlockSpec((D_HID, D_OUT_PAD), lambda i: (0, 0)),   # W2 (padded)
                pl.BlockSpec((1, D_OUT_PAD), lambda i: (0, 0)),       # b2 (padded)
            ],
            out_specs=pl.BlockSpec((tile_b, D_OUT_PAD), lambda i: (i, 0)),
        ),
        compiler_params=pltpu.CompilerParams(
            dimension_semantics=("parallel",),
            vmem_limit_bytes=32 * 1024 * 1024,
        ),
        cost_estimate=cost,
    )(x, w1_bf, b1_f32, w2_pad, b2_pad)

    # Strip batch padding / partial-block tail and the zero output lanes.
    return out_padded[:B, :D_OUT].astype(out_dtype)


def init_params(key):
    # PyTorch Linear default init: U(-1/sqrt(fan_in), 1/sqrt(fan_in))
    k1, k2, k3, k4 = jax.random.split(key, 4)
    bound1 = 1.0 / (D_IN ** 0.5)
    bound2 = 1.0 / (D_HID ** 0.5)
    w1 = jax.random.uniform(k1, (D_IN, D_HID), jnp.float32, -bound1, bound1)
    b1 = jax.random.uniform(k2, (1, D_HID), jnp.float32, -bound1, bound1)
    w2 = jax.random.uniform(k3, (D_HID, D_OUT), jnp.float32, -bound2, bound2)
    b2 = jax.random.uniform(k4, (1, D_OUT), jnp.float32, -bound2, bound2)
    return w1, b1, w2, b2


if __name__ == "__main__":
    key = jax.random.PRNGKey(0)
    kx, kp = jax.random.split(key)

    B = 8  # small batch; tile adapts (8-row single block)
    x = jax.random.normal(kx, (B, D_IN), dtype=jnp.float32)
    w1, b1, w2, b2 = init_params(kp)

    # One-time parameter prep, then the jitted forward only runs the kernel.
    params = prepare_params(w1, b1, w2, b2)
    fwd = jax.jit(trained_forward)

    out = fwd(x, *params)
    out = jax.block_until_ready(out)

    # Pure-JAX f32 reference (eval-mode dropout == identity); tolerance relaxed
    # for the bf16 operand / f32-accumulate / bf16-store path.
    ref = jnp.maximum(x @ w1 + b1, 0.0) @ w2 + b2
    assert out.shape == (B, D_OUT)
    assert jnp.allclose(out, ref, atol=5e-2, rtol=5e-2), (
        float(jnp.max(jnp.abs(out - ref))))

    print("KERNEL_OK")
</pallas_src>

<mosaic_0001>
module attributes {stable_mosaic.version = 11 : i64} {
  func.func @mlp_kernel(%arg0: i32, %arg1: memref<8x512xf32, #tpu.memory_space<vmem>>, %arg2: memref<512x512xbf16, #tpu.memory_space<vmem>>, %arg3: memref<1x512xf32, #tpu.memory_space<vmem>>, %arg4: memref<512x128xbf16, #tpu.memory_space<vmem>>, %arg5: memref<1x128xf32, #tpu.memory_space<vmem>>, %arg6: memref<8x128xbf16, #tpu.memory_space<vmem>>) attributes {dimension_semantics = [#tpu.dimension_semantics<parallel>], iteration_bounds = array<i64: 1>, scalar_prefetch = 0 : i64, scratch_operands = 0 : i64, tpu.core_type = #tpu.core_type<tc>, window_params = [{transform_indices = @transform_0, window_bounds = array<i64: 8, 512>}, {pipeline_mode = #tpu.pipeline_mode<synchronous>, transform_indices = @transform_1, window_bounds = array<i64: 512, 512>}, {pipeline_mode = #tpu.pipeline_mode<synchronous>, transform_indices = @transform_2, window_bounds = array<i64: 1, 512>}, {pipeline_mode = #tpu.pipeline_mode<synchronous>, transform_indices = @transform_3, window_bounds = array<i64: 512, 128>}, {pipeline_mode = #tpu.pipeline_mode<synchronous>, transform_indices = @transform_4, window_bounds = array<i64: 1, 128>}, {transform_indices = @transform_5, window_bounds = array<i64: 8, 128>}]} {
    %c0 = arith.constant 0 : index
    %c0_0 = arith.constant 0 : index
    %0 = vector.load %arg1[%c0, %c0_0] : memref<8x512xf32, #tpu.memory_space<vmem>>, vector<8x512xf32>
    %1 = arith.truncf %0 : vector<8x512xf32> to vector<8x512xbf16>
    %c0_1 = arith.constant 0 : index
    %c0_2 = arith.constant 0 : index
    %2 = vector.load %arg2[%c0_1, %c0_2] : memref<512x512xbf16, #tpu.memory_space<vmem>>, vector<512x512xbf16>
    %cst = arith.constant dense<0.000000e+00> : vector<8x512xf32>
    %3 = tpu.matmul %1, %2, %cst {dimension_numbers = #tpu.dot_dimension_numbers<[1], [0], [0], [1], [0, 0, 1, 1], [], []>} : vector<8x512xbf16>, vector<512x512xbf16>, vector<8x512xf32> -> vector<8x512xf32>
    %c0_3 = arith.constant 0 : index
    %c0_4 = arith.constant 0 : index
    %4 = vector.load %arg3[%c0_3, %c0_4] : memref<1x512xf32, #tpu.memory_space<vmem>>, vector<1x512xf32>
    %5 = vector.broadcast %4 : vector<1x512xf32> to vector<8x512xf32>
    %6 = arith.addf %3, %5 : vector<8x512xf32>
    %cst_5 = arith.constant 0.000000e+00 : f32
    %7 = vector.broadcast %cst_5 : f32 to vector<8x512xf32>
    %8 = arith.maximumf %6, %7 : vector<8x512xf32>
    %9 = arith.truncf %8 : vector<8x512xf32> to vector<8x512xbf16>
    %c0_6 = arith.constant 0 : index
    %c0_7 = arith.constant 0 : index
    %10 = vector.load %arg4[%c0_6, %c0_7] : memref<512x128xbf16, #tpu.memory_space<vmem>>, vector<512x128xbf16>
    %cst_8 = arith.constant dense<0.000000e+00> : vector<8x128xf32>
    %11 = tpu.matmul %9, %10, %cst_8 {dimension_numbers = #tpu.dot_dimension_numbers<[1], [0], [0], [1], [0, 0, 1, 1], [], []>} : vector<8x512xbf16>, vector<512x128xbf16>, vector<8x128xf32> -> vector<8x128xf32>
    %c0_9 = arith.constant 0 : index
    %c0_10 = arith.constant 0 : index
    %12 = vector.load %arg5[%c0_9, %c0_10] : memref<1x128xf32, #tpu.memory_space<vmem>>, vector<1x128xf32>
    %13 = vector.broadcast %12 : vector<1x128xf32> to vector<8x128xf32>
    %14 = arith.addf %11, %13 : vector<8x128xf32>
    %15 = arith.truncf %14 : vector<8x128xf32> to vector<8x128xbf16>
    %c0_11 = arith.constant 0 : index
    %c0_12 = arith.constant 0 : index
    %16 = vector.load %arg6[%c0_11, %c0_12] : memref<8x128xbf16, #tpu.memory_space<vmem>>, vector<8x128xbf16>
    tpu.vector_store %arg6[%c0_11, %c0_12], %15 {strides = array<i32>} : memref<8x128xbf16, #tpu.memory_space<vmem>>, vector<8x128xbf16>,
    return
  }
  func.func @transform_0(%arg0: i32) -> (i32, i32) {
    %c0_i32 = arith.constant 0 : i32
    %c0_i32_0 = arith.constant 0 : i32
    return %arg0, %c0_i32 : i32, i32
  }
  func.func @transform_1(%arg0: i32) -> (i32, i32) {
    %c0_i32 = arith.constant 0 : i32
    %c0_i32_0 = arith.constant 0 : i32
    %c0_i32_1 = arith.constant 0 : i32
    return %c0_i32, %c0_i32_0 : i32, i32
  }
  func.func @transform_2(%arg0: i32) -> (i32, i32) {
    %c0_i32 = arith.constant 0 : i32
    %c0_i32_0 = arith.constant 0 : i32
    %c0_i32_1 = arith.constant 0 : i32
    return %c0_i32, %c0_i32_0 : i32, i32
  }
  func.func @transform_3(%arg0: i32) -> (i32, i32) {
    %c0_i32 = arith.constant 0 : i32
    %c0_i32_0 = arith.constant 0 : i32
    %c0_i32_1 = arith.constant 0 : i32
    return %c0_i32, %c0_i32_0 : i32, i32
  }
  func.func @transform_4(%arg0: i32) -> (i32, i32) {
    %c0_i32 = arith.constant 0 : i32
    %c0_i32_0 = arith.constant 0 : i32
    %c0_i32_1 = arith.constant 0 : i32
    return %c0_i32, %c0_i32_0 : i32, i32
  }
  func.func @transform_5(%arg0: i32) -> (i32, i32) {
    %c0_i32 = arith.constant 0 : i32
    %c0_i32_0 = arith.constant 0 : i32
    return %arg0, %c0_i32 : i32, i32
  }
}

</mosaic_0001>

<bundles_post_ra>
// kernel: trained_forward.1
= control target key start
LH: loop header
LB: loop body
LE: loop exit
PB: predicated region body
PF: predicated region fallthrough
CT: control target
= control target key end

     0   :  { %10 = vsyncpa [#allocation3], 0  ;;  %s1981_s0 = inlined_call_operand.hbm [shape: f32[8,512], index: 0, kind: input, shape index: {}]   ;;  %s1982_s1 = inlined_call_operand.hbm [shape: bf16[512,512], index: 1, kind: input, shape index: {}]   ;;  %s1983_s2 = inlined_call_operand.vmem [shape: f32[1,512], index: 2, kind: input, shape index: {}]   ;;  %s1984_s3 = inlined_call_operand.hbm [shape: bf16[512,128], index: 3, kind: input, shape index: {}]   ;;  %s1985_s4 = inlined_call_operand.vmem [shape: f32[1,128], index: 4, kind: input, shape index: {}]   ;;  %s1986_s5 = inlined_call_operand.vmem [shape: bf16[8,128], index: 5, kind: output, shape index: {}]  }
   0x1   :  { %11 = vsyncpa [#allocation5], 0  ;;  %s1899_s18 = smov [#allocation4]   ;;  %s1829_s22 = scalar_lea.hbm %s1982_s1, 16384 }
   0x2   :  { %s27_s19 = sshll.u32 %s1899_s18, 4  ;;  %p1830_p0 = scmp.ne.s32.totalorder %s1982_s1, %s1829_s22  ;;  %s28_s19 = int_to_ptr.vmem [resolvable:$true] %s27_s19 }
   0x3   :  { %p1833_p1 = scmp.lt.u32.totalorder %s1829_s22, %s1982_s1 }
   0x5   :  { %p1835_p2 = pnand %p1833_p1, %p1830_p0 }
   0x7   :  { %1838 = shalt.err (!%p1835_p2)
}
   0x8   :  { %s1839_s27 = scalar_lea.vmem %s28_s19, 16384  ;;  %p1844_p4 = scmp.lt.s32.totalorder %s28_s19, %s28_s19 }
   0x9   :  { %p1840_p3 = scmp.ne.s32.totalorder %s28_s19, %s1839_s27  ;;  %p1845_p5 = scmp.lt.s32.totalorder %s1839_s27, %s1839_s27 }
   0xb   :  { %p1846_p6 = por %p1845_p5, %p1844_p4 }
   0xd   :  { %p1847_p7 = pnand %p1846_p6, %p1840_p3 }
   0xf   :  { %1850 = shalt.err (!%p1847_p7)
}
  0x10   :  { %s1900_s28 = smov 256   ;;  %s1901_s29 = smov 16  }
  0x11   :  { %33 = dma.hbm_to_vmem [thread:$0]  %s1982_s1, 16384, %s28_s19, [#allocation5], %s1900_s28, %s1900_s28, %s1901_s29  }
  0x12   :  { %s1902_s7 = smov [#allocation2]   ;;  %s1903_s9 = smov [#allocation6]  }
  0x13   :  { %s18_s8 = sshll.u32 %s1902_s7, 4  ;;  %s41_s10 = sshll.u32 %s1903_s9, 4  ;;  %s19_s8 = int_to_ptr.vmem [resolvable:$true] %s18_s8  ;;  %s42_s10 = int_to_ptr.vmem [resolvable:$true] %s41_s10 }
  0x14   :  { %s1851_s13 = scalar_lea.hbm %s1981_s0, 512 }
  0x15   :  { %p1852_p8 = scmp.ne.s32.totalorder %s1981_s0, %s1851_s13  ;;  %p1855_p9 = scmp.lt.u32.totalorder %s1851_s13, %s1981_s0 }
  0x17   :  { %p1857_p10 = pnand %p1855_p9, %p1852_p8 }
  0x19   :  { %1860 = shalt.err (!%p1857_p10)
}
  0x1a   :  { %s1861_s1 = scalar_lea.vmem %s19_s8, 512  ;;  %p1866_p12 = scmp.lt.s32.totalorder %s19_s8, %s19_s8 }
  0x1b   :  { %p1862_p11 = scmp.ne.s32.totalorder %s19_s8, %s1861_s1  ;;  %p1867_p13 = scmp.lt.s32.totalorder %s1861_s1, %s1861_s1 }
  0x1d   :  { %p1868_p0 = por %p1867_p13, %p1866_p12 }
  0x1f   :  { %p1869_p1 = pnand %p1868_p0, %p1862_p11 }
  0x21   :  { %1872 = shalt.err (!%p1869_p1)
}
  0x22   :  { %21 = dma.hbm_to_vmem [thread:$0]  %s1981_s0, 512, %s19_s8, [#allocation3]  }
  0x23   :  { %s1873_s22 = scalar_lea.hbm %s1984_s3, 4096 }
  0x24   :  { %p1874_p2 = scmp.ne.s32.totalorder %s1984_s3, %s1873_s22  ;;  %p1877_p3 = scmp.lt.u32.totalorder %s1873_s22, %s1984_s3 }
  0x26   :  { %p1879_p4 = pnand %p1877_p3, %p1874_p2 }
  0x28   :  { %1882 = shalt.err (!%p1879_p4)
}
  0x29   :  { %s1883_s27 = scalar_lea.vmem %s42_s10, 4096  ;;  %p1888_p6 = scmp.lt.s32.totalorder %s42_s10, %s42_s10 }
  0x2a   :  { %p1884_p5 = scmp.ne.s32.totalorder %s42_s10, %s1883_s27  ;;  %p1889_p7 = scmp.lt.s32.totalorder %s1883_s27, %s1883_s27 }
  0x2c   :  { %p1890_p8 = por %p1889_p7, %p1888_p6 }
  0x2e   :  { %p1891_p9 = pnand %p1890_p8, %p1884_p5 }
  0x30   :  { %1894 = shalt.err (!%p1891_p9)
}
  0x31   :  { %s1904_s0 = smov 64   ;;  %s1905_s28 = smov 4  }
  0x32   :  { %47 = dma.hbm_to_vmem [thread:$0]  %s1984_s3, 4096, %s42_s10, [#allocation5], %s1904_s0, %s1904_s0, %s1905_s28  }
  0x33   :  { %1895 = dma.done.wait [#allocation3], 512  }
  0x34   :  { %1896 = vsyncadd [#allocation3], 4294966784 }
  0x35   :  { %1897 = dma.done.wait [#allocation5], 20480  }
  0x36   :  { %1898 = vsyncadd [#allocation5], 4294946816  ;;  %v1605_v0 = vld [vmem:[#allocation4 + $0x4] ss:$16 sps:$4 sm:$0xff]   ;;  %v1607_v1 = vld [vmem:[#allocation4 + $0xc] ss:$16 sps:$4 sm:$0xff]  }
  0x37   :  { %858 = vmatprep.subr.bf16.mxu0 %v1605_v0  ;;  %v1609_v2 = vld [vmem:[#allocation4] ss:$16 sps:$4 sm:$0xff]   ;;  %v1610_v3 = vld [vmem:[#allocation4 + $0x8] ss:$16 sps:$4 sm:$0xff]   ;;  %940 = vmatprep.subr.bf16.mxu1 %v1607_v1  ;;  %v1611_v4 = vld [vmem:[#allocation4 + $0x24] ss:$16 sps:$4 sm:$0xff]  }
  0x38   :  { %859 = vmatpush1.bf16.msra.mxu0 %v1609_v2  ;;  %941 = vmatpush1.bf16.msra.mxu1 %v1610_v3  ;;  %v1613_v5 = vld [vmem:[#allocation4 + $0x2c] ss:$16 sps:$4 sm:$0xff]   ;;  %v1615_v6 = vld [vmem:[#allocation4 + $0x20] ss:$16 sps:$4 sm:$0xff]   ;;  %v1616_v7 = vld [vmem:[#allocation4 + $0x28] ss:$16 sps:$4 sm:$0xff]  }
  0x39   :  { %860 = vmatprep.subr.bf16.mxu0 %v1611_v4  ;;  %942 = vmatprep.subr.bf16.mxu1 %v1613_v5  ;;  %v1617_v8 = vld [vmem:[#allocation4 + $0x44] ss:$16 sps:$4 sm:$0xff]   ;;  %v1619_v9 = vld [vmem:[#allocation4 + $0x4c] ss:$16 sps:$4 sm:$0xff]   ;;  %v1621_v10 = vld [vmem:[#allocation4 + $0x40] ss:$16 sps:$4 sm:$0xff]  }
  0x3a   :  { %v1622_v11 = vld [vmem:[#allocation4 + $0x48] ss:$16 sps:$4 sm:$0xff]   ;;  %v1623_v12 = vld [vmem:[#allocation4 + $0x64] ss:$16 sps:$4 sm:$0xff]   ;;  %v1625_v13 = vld [vmem:[#allocation4 + $0x6c] ss:$16 sps:$4 sm:$0xff]  }
  0x3b   :  { %v1627_v14 = vld [vmem:[#allocation4 + $0x60] ss:$16 sps:$4 sm:$0xff]   ;;  %v1628_v15 = vld [vmem:[#allocation4 + $0x68] ss:$16 sps:$4 sm:$0xff]   ;;  %v1629_v16 = vld [vmem:[#allocation4 + $0x84] ss:$16 sps:$4 sm:$0xff]  }
  0x3c   :  { %861 = vmatpush1.bf16.msra.mxu0 %v1615_v6  ;;  %943 = vmatpush1.bf16.msra.mxu1 %v1616_v7  ;;  %v1631_v17 = vld [vmem:[#allocation4 + $0x8c] ss:$16 sps:$4 sm:$0xff]   ;;  %v1633_v18 = vld [vmem:[#allocation4 + $0x80] ss:$16 sps:$4 sm:$0xff]   ;;  %v1634_v19 = vld [vmem:[#allocation4 + $0x88] ss:$16 sps:$4 sm:$0xff]  }
  0x3d   :  { %862 = vmatprep.subr.bf16.mxu0 %v1617_v8  ;;  %944 = vmatprep.subr.bf16.mxu1 %v1619_v9  ;;  %v1635_v20 = vld [vmem:[#allocation4 + $0xa4] ss:$16 sps:$4 sm:$0xff]   ;;  %v1637_v21 = vld [vmem:[#allocation4 + $0xac] ss:$16 sps:$4 sm:$0xff]   ;;  %v1639_v22 = vld [vmem:[#allocation4 + $0xa0] ss:$16 sps:$4 sm:$0xff]  }
  0x3e   :  { %v1640_v23 = vld [vmem:[#allocation4 + $0xa8] ss:$16 sps:$4 sm:$0xff]   ;;  %v1641_v24 = vld [vmem:[#allocation4 + $0xc4] ss:$16 sps:$4 sm:$0xff]   ;;  %v1643_v25 = vld [vmem:[#allocation4 + $0xcc] ss:$16 sps:$4 sm:$0xff]  }
  0x3f   :  { %v1645_v26 = vld [vmem:[#allocation4 + $0xc0] ss:$16 sps:$4 sm:$0xff]   ;;  %v1646_v27 = vld [vmem:[#allocation4 + $0xc8] ss:$16 sps:$4 sm:$0xff]   ;;  %v1647_v28 = vld [vmem:[#allocation4 + $0xe4] ss:$16 sps:$4 sm:$0xff]  }
  0x40   :  { %863 = vmatpush1.bf16.msra.mxu0 %v1621_v10  ;;  %945 = vmatpush1.bf16.msra.mxu1 %v1622_v11  ;;  %v1649_v29 = vld [vmem:[#allocation4 + $0xec] ss:$16 sps:$4 sm:$0xff]   ;;  %v1651_v30 = vld [vmem:[#allocation4 + $0xe0] ss:$16 sps:$4 sm:$0xff]   ;;  %v1652_v31 = vld [vmem:[#allocation4 + $0xe8] ss:$16 sps:$4 sm:$0xff]  }
  0x41   :  { %864 = vmatprep.subr.bf16.mxu0 %v1623_v12  ;;  %946 = vmatprep.subr.bf16.mxu1 %v1625_v13  ;;  %v1653_v32 = vld [vmem:[#allocation4 + $0x104] ss:$16 sps:$4 sm:$0xff]   ;;  %v1655_v33 = vld [vmem:[#allocation4 + $0x10c] ss:$16 sps:$4 sm:$0xff]   ;;  %v1657_v34 = vld [vmem:[#allocation4 + $0x100] ss:$16 sps:$4 sm:$0xff]  }
  0x42   :  { %v1658_v35 = vld [vmem:[#allocation4 + $0x108] ss:$16 sps:$4 sm:$0xff]   ;;  %v1659_v36 = vld [vmem:[#allocation4 + $0x124] ss:$16 sps:$4 sm:$0xff]   ;;  %v1661_v37 = vld [vmem:[#allocation4 + $0x12c] ss:$16 sps:$4 sm:$0xff]  }
  0x43   :  { %v1663_v38 = vld [vmem:[#allocation4 + $0x120] ss:$16 sps:$4 sm:$0xff]   ;;  %v1664_v39 = vld [vmem:[#allocation4 + $0x128] ss:$16 sps:$4 sm:$0xff]   ;;  %v1665_v40 = vld [vmem:[#allocation4 + $0x144] ss:$16 sps:$4 sm:$0xff]  }
  0x44   :  { %865 = vmatpush1.bf16.msra.mxu0 %v1627_v14  ;;  %947 = vmatpush1.bf16.msra.mxu1 %v1628_v15  ;;  %v1667_v41 = vld [vmem:[#allocation4 + $0x14c] ss:$16 sps:$4 sm:$0xff]   ;;  %v1669_v42 = vld [vmem:[#allocation4 + $0x140] ss:$16 sps:$4 sm:$0xff]   ;;  %v1670_v43 = vld [vmem:[#allocation4 + $0x148] ss:$16 sps:$4 sm:$0xff]  }
  0x45   :  { %866 = vmatprep.subr.bf16.mxu0 %v1629_v16  ;;  %948 = vmatprep.subr.bf16.mxu1 %v1631_v17  ;;  %v1671_v44 = vld [vmem:[#allocation4 + $0x164] ss:$16 sps:$4 sm:$0xff]   ;;  %v1673_v45 = vld [vmem:[#allocation4 + $0x16c] ss:$16 sps:$4 sm:$0xff]   ;;  %v1675_v47 = vld [vmem:[#allocation4 + $0x160] ss:$16 sps:$4 sm:$0xff]  }
  0x46   :  { %v61_v46 = vld [vmem:[#allocation2 + $0x8] sm:$0xff]  ;;  %v1677_v50 = vld [vmem:[#allocation4 + $0x184] ss:$16 sps:$4 sm:$0xff]   ;;  %v1681_v52 = vld [vmem:[#allocation4 + $0x180] ss:$16 sps:$4 sm:$0xff]  }
  0x47   :  { %v65_v48 = vpack.c.bf16 %v61_v46, %v61_v46  ;;  %v1676_v49 = vld [vmem:[#allocation4 + $0x168] ss:$16 sps:$4 sm:$0xff]   ;;  %v1679_v51 = vld [vmem:[#allocation4 + $0x18c] ss:$16 sps:$4 sm:$0xff]   ;;  %v1683_v54 = vld [vmem:[#allocation4 + $0x1a4] ss:$16 sps:$4 sm:$0xff]  }
  0x48   :  { %867 = vmatpush1.bf16.msra.mxu0 %v1633_v18  ;;  %949 = vmatpush1.bf16.msra.mxu1 %v1634_v19  ;;  %v1682_v53 = vld [vmem:[#allocation4 + $0x188] ss:$16 sps:$4 sm:$0xff]   ;;  %v1685_v55 = vld [vmem:[#allocation4 + $0x1ac] ss:$16 sps:$4 sm:$0xff]   ;;  %v1687_v56 = vld [vmem:[#allocation4 + $0x1a0] ss:$16 sps:$4 sm:$0xff]  }
  0x49   :  { %868 = vmatprep.subr.bf16.mxu0 %v1635_v20  ;;  %950 = vmatprep.subr.bf16.mxu1 %v1637_v21  ;;  %v1688_v57 = vld [vmem:[#allocation4 + $0x1a8] ss:$16 sps:$4 sm:$0xff]   ;;  %v1689_v58 = vld [vmem:[#allocation4 + $0x1c4] ss:$16 sps:$4 sm:$0xff]   ;;  %v1691_v59 = vld [vmem:[#allocation4 + $0x1cc] ss:$16 sps:$4 sm:$0xff]  }
  0x4a   :  { %890 = vmatprep.mubr.bf16.mxu0 %v65_v48  ;;  %972 = vmatprep.mubr.bf16.mxu1 %v65_v48  ;;  %v1693_v60 = vld [vmem:[#allocation4 + $0x1c0] ss:$16 sps:$4 sm:$0xff]   ;;  %v1694_v61 = vld [vmem:[#allocation4 + $0x1c8] ss:$16 sps:$4 sm:$0xff]   ;;  %v1695_v62 = vld [vmem:[#allocation4 + $0x1e4] ss:$16 sps:$4 sm:$0xff]  }
  0x4b   :  { %v1697_v63 = vld [vmem:[#allocation4 + $0x1ec] ss:$16 sps:$4 sm:$0xff]   ;;  %v1699_v0 = vld [vmem:[#allocation4 + $0x1e0] ss:$16 sps:$4 sm:$0xff]   ;;  %v1700_v1 = vld [vmem:[#allocation4 + $0x1e8] ss:$16 sps:$4 sm:$0xff]  }
  0x4c   :  { %869 = vmatpush1.bf16.msra.mxu0 %v1639_v22  ;;  %951 = vmatpush1.bf16.msra.mxu1 %v1640_v23  ;;  %v60_v2 = vld [vmem:[#allocation2] sm:$0xff]  ;;  %v1706_v4 = vld [vmem:[#allocation4 + $0x20c] ss:$16 sps:$4 sm:$0xff]   ;;  %v1704_v7 = vld [vmem:[#allocation4 + $0x208] ss:$16 sps:$4 sm:$0xff]  }
  0x4d   :  { %870 = vmatprep.subr.bf16.mxu0 %v1641_v24  ;;  %952 = vmatprep.subr.bf16.mxu1 %v1643_v25  ;;  %v1703_v3 = vld [vmem:[#allocation4 + $0x204] ss:$16 sps:$4 sm:$0xff]   ;;  %v64_v5 = vpack.c.bf16 %v60_v2, %v60_v2  ;;  %v1701_v6 = vld [vmem:[#allocation4 + $0x200] ss:$16 sps:$4 sm:$0xff]   ;;  %v1712_v9 = vld [vmem:[#allocation4 + $0x22c] ss:$16 sps:$4 sm:$0xff]  }
  0x4e   :  { %v1709_v8 = vld [vmem:[#allocation4 + $0x224] ss:$16 sps:$4 sm:$0xff]   ;;  %v1707_v10 = vld [vmem:[#allocation4 + $0x220] ss:$16 sps:$4 sm:$0xff]   ;;  %v1710_v11 = vld [vmem:[#allocation4 + $0x228] ss:$16 sps:$4 sm:$0xff]  }
  0x4f   :  { %v1715_v12 = vld [vmem:[#allocation4 + $0x244] ss:$16 sps:$4 sm:$0xff]   ;;  %v1718_v13 = vld [vmem:[#allocation4 + $0x24c] ss:$16 sps:$4 sm:$0xff]   ;;  %v1713_v14 = vld [vmem:[#allocation4 + $0x240] ss:$16 sps:$4 sm:$0xff]  }
  0x50   :  { %871 = vmatpush1.bf16.msra.mxu0 %v1645_v26  ;;  %953 = vmatpush1.bf16.msra.mxu1 %v1646_v27  ;;  %v1716_v15 = vld [vmem:[#allocation4 + $0x248] ss:$16 sps:$4 sm:$0xff]   ;;  %v1721_v16 = vld [vmem:[#allocation4 + $0x264] ss:$16 sps:$4 sm:$0xff]   ;;  %v1724_v17 = vld [vmem:[#allocation4 + $0x26c] ss:$16 sps:$4 sm:$0xff]  }
  0x51   :  { %872 = vmatprep.subr.bf16.mxu0 %v1647_v28  ;;  %954 = vmatprep.subr.bf16.mxu1 %v1649_v29  ;;  %v1719_v18 = vld [vmem:[#allocation4 + $0x260] ss:$16 sps:$4 sm:$0xff]   ;;  %v1722_v19 = vld [vmem:[#allocation4 + $0x268] ss:$16 sps:$4 sm:$0xff]   ;;  %v1727_v20 = vld [vmem:[#allocation4 + $0x284] ss:$16 sps:$4 sm:$0xff]  }
  0x52   :  { %v1730_v21 = vld [vmem:[#allocation4 + $0x28c] ss:$16 sps:$4 sm:$0xff]   ;;  %v1725_v22 = vld [vmem:[#allocation4 + $0x280] ss:$16 sps:$4 sm:$0xff]   ;;  %v1728_v23 = vld [vmem:[#allocation4 + $0x288] ss:$16 sps:$4 sm:$0xff]  }
  0x53   :  { %v1733_v24 = vld [vmem:[#allocation4 + $0x2a4] ss:$16 sps:$4 sm:$0xff]   ;;  %v1736_v25 = vld [vmem:[#allocation4 + $0x2ac] ss:$16 sps:$4 sm:$0xff]   ;;  %v1731_v26 = vld [vmem:[#allocation4 + $0x2a0] ss:$16 sps:$4 sm:$0xff]  }
  0x54   :  { %873 = vmatpush1.bf16.msra.mxu0 %v1651_v30  ;;  %955 = vmatpush1.bf16.msra.mxu1 %v1652_v31  ;;  %v1734_v27 = vld [vmem:[#allocation4 + $0x2a8] ss:$16 sps:$4 sm:$0xff]   ;;  %v1739_v28 = vld [vmem:[#allocation4 + $0x2c4] ss:$16 sps:$4 sm:$0xff]   ;;  %v1742_v29 = vld [vmem:[#allocation4 + $0x2cc] ss:$16 sps:$4 sm:$0xff]  }
  0x55   :  { %874 = vmatprep.subr.bf16.mxu0 %v1653_v32  ;;  %956 = vmatprep.subr.bf16.mxu1 %v1655_v33  ;;  %v1737_v30 = vld [vmem:[#allocation4 + $0x2c0] ss:$16 sps:$4 sm:$0xff]   ;;  %v63_v31 = vld [vmem:[#allocation2 + $0x18] sm:$0xff]  ;;  %v1763_v46 = vld [vmem:[#allocation4 + $0x344] ss:$16 sps:$4 sm:$0xff]  }
  0x56   :  { %v1740_v32 = vld [vmem:[#allocation4 + $0x2c8] ss:$16 sps:$4 sm:$0xff]   ;;  %v67_v33 = vpack.c.bf16 %v63_v31, %v63_v31  ;;  %v1761_v48 = vld [vmem:[#allocation4 + $0x340] ss:$16 sps:$4 sm:$0xff]   ;;  %v1793_v2 = vld [vmem:[#allocation4 + $0x3e4] ss:$16 sps:$4 sm:$0xff]  }
  0x57   :  { %v1820_v31 = vld [vmem:[#allocation6 + $0xa8] sm:$0xff]  }
  0x58   :  { %875 = vmatpush1.bf16.msra.mxu0 %v1657_v34  ;;  %957 = vmatpush1.bf16.msra.mxu1 %v1658_v35  ;;  %v1745_v34 = vld [vmem:[#allocation4 + $0x2e4] ss:$16 sps:$4 sm:$0xff]   ;;  %v1748_v35 = vld [vmem:[#allocation4 + $0x2ec] ss:$16 sps:$4 sm:$0xff]  }
  0x59   :  { %876 = vmatprep.subr.bf16.mxu0 %v1659_v36  ;;  %958 = vmatprep.subr.bf16.mxu1 %v1661_v37  ;;  %v1743_v36 = vld [vmem:[#allocation4 + $0x2e0] ss:$16 sps:$4 sm:$0xff]   ;;  %v1746_v37 = vld [vmem:[#allocation4 + $0x2e8] ss:$16 sps:$4 sm:$0xff]  }
  0x5c   :  { %877 = vmatpush1.bf16.msra.mxu0 %v1663_v38  ;;  %959 = vmatpush1.bf16.msra.mxu1 %v1664_v39  ;;  %v1751_v38 = vld [vmem:[#allocation4 + $0x304] ss:$16 sps:$4 sm:$0xff]   ;;  %v1754_v39 = vld [vmem:[#allocation4 + $0x30c] ss:$16 sps:$4 sm:$0xff]  }
  0x5d   :  { %878 = vmatprep.subr.bf16.mxu0 %v1665_v40  ;;  %960 = vmatprep.subr.bf16.mxu1 %v1667_v41  ;;  %v1749_v40 = vld [vmem:[#allocation4 + $0x300] ss:$16 sps:$4 sm:$0xff]   ;;  %v1752_v41 = vld [vmem:[#allocation4 + $0x308] ss:$16 sps:$4 sm:$0xff]  }
  0x60   :  { %879 = vmatpush1.bf16.msra.mxu0 %v1669_v42  ;;  %961 = vmatpush1.bf16.msra.mxu1 %v1670_v43  ;;  %v1757_v42 = vld [vmem:[#allocation4 + $0x324] ss:$16 sps:$4 sm:$0xff]   ;;  %v1760_v43 = vld [vmem:[#allocation4 + $0x32c] ss:$16 sps:$4 sm:$0xff]  }
  0x61   :  { %880 = vmatprep.subr.bf16.mxu0 %v1671_v44  ;;  %962 = vmatprep.subr.bf16.mxu1 %v1673_v45  ;;  %v1755_v44 = vld [vmem:[#allocation4 + $0x320] ss:$16 sps:$4 sm:$0xff]   ;;  %v1758_v45 = vld [vmem:[#allocation4 + $0x328] ss:$16 sps:$4 sm:$0xff]  }
  0x64   :  { %881 = vmatpush1.bf16.msra.mxu0 %v1675_v47  ;;  %963 = vmatpush1.bf16.msra.mxu1 %v1676_v49  ;;  %v1766_v47 = vld [vmem:[#allocation4 + $0x34c] ss:$16 sps:$4 sm:$0xff]   ;;  %v1764_v49 = vld [vmem:[#allocation4 + $0x348] ss:$16 sps:$4 sm:$0xff]  }
  0x65   :  { %882 = vmatprep.subr.bf16.mxu0 %v1677_v50  ;;  %964 = vmatprep.subr.bf16.mxu1 %v1679_v51  ;;  %v1769_v50 = vld [vmem:[#allocation4 + $0x364] ss:$16 sps:$4 sm:$0xff]   ;;  %v1772_v51 = vld [vmem:[#allocation4 + $0x36c] ss:$16 sps:$4 sm:$0xff]  }
  0x68   :  { %883 = vmatpush1.bf16.msra.mxu0 %v1681_v52  ;;  %965 = vmatpush1.bf16.msra.mxu1 %v1682_v53  ;;  %v1767_v52 = vld [vmem:[#allocation4 + $0x360] ss:$16 sps:$4 sm:$0xff]   ;;  %v1770_v53 = vld [vmem:[#allocation4 + $0x368] ss:$16 sps:$4 sm:$0xff]  }
  0x69   :  { %884 = vmatprep.subr.bf16.mxu0 %v1683_v54  ;;  %966 = vmatprep.subr.bf16.mxu1 %v1685_v55  ;;  %v1775_v54 = vld [vmem:[#allocation4 + $0x384] ss:$16 sps:$4 sm:$0xff]   ;;  %v1778_v55 = vld [vmem:[#allocation4 + $0x38c] ss:$16 sps:$4 sm:$0xff]  }
  0x6c   :  { %885 = vmatpush1.bf16.msra.mxu0 %v1687_v56  ;;  %967 = vmatpush1.bf16.msra.mxu1 %v1688_v57  ;;  %v1773_v56 = vld [vmem:[#allocation4 + $0x380] ss:$16 sps:$4 sm:$0xff]   ;;  %v1776_v57 = vld [vmem:[#allocation4 + $0x388] ss:$16 sps:$4 sm:$0xff]  }
  0x6d   :  { %886 = vmatprep.subr.bf16.mxu0 %v1689_v58  ;;  %968 = vmatprep.subr.bf16.mxu1 %v1691_v59  ;;  %v1781_v58 = vld [vmem:[#allocation4 + $0x3a4] ss:$16 sps:$4 sm:$0xff]   ;;  %v1784_v59 = vld [vmem:[#allocation4 + $0x3ac] ss:$16 sps:$4 sm:$0xff]  }
  0x70   :  { %887 = vmatpush1.bf16.msra.mxu0 %v1693_v60  ;;  %969 = vmatpush1.bf16.msra.mxu1 %v1694_v61  ;;  %v1779_v60 = vld [vmem:[#allocation4 + $0x3a0] ss:$16 sps:$4 sm:$0xff]   ;;  %v1782_v61 = vld [vmem:[#allocation4 + $0x3a8] ss:$16 sps:$4 sm:$0xff]  }
  0x71   :  { %888 = vmatprep.subr.bf16.mxu0 %v1695_v62  ;;  %970 = vmatprep.subr.bf16.mxu1 %v1697_v63  ;;  %v1787_v62 = vld [vmem:[#allocation4 + $0x3c4] ss:$16 sps:$4 sm:$0xff]   ;;  %v1790_v63 = vld [vmem:[#allocation4 + $0x3cc] ss:$16 sps:$4 sm:$0xff]  }
  0x74   :  { %889 = vmatpush1.bf16.msra.mxu0 %v1699_v0  ;;  %971 = vmatpush1.bf16.msra.mxu1 %v1700_v1  ;;  %v1785_v0 = vld [vmem:[#allocation4 + $0x3c0] ss:$16 sps:$4 sm:$0xff]   ;;  %v1788_v1 = vld [vmem:[#allocation4 + $0x3c8] ss:$16 sps:$4 sm:$0xff]  }
  0x75   :  { %899 = vmatprep.subr.bf16.mxu0 %v1703_v3  ;;  %981 = vmatprep.subr.bf16.mxu1 %v1706_v4  ;;  %v1796_v3 = vld [vmem:[#allocation4 + $0x3ec] ss:$16 sps:$4 sm:$0xff]   ;;  %v1791_v4 = vld [vmem:[#allocation4 + $0x3e0] ss:$16 sps:$4 sm:$0xff]  }
  0x77   :  { %891 = vmatmul.mubr.bf16.vlgmr.msra.gmra.mrb[0].mxu0 %v64_v5  ;;  %973 = vmatmul.mubr.bf16.vlgmr.msra.gmra.mrb[0].mxu1 %v64_v5  ;;  %v1794_v5 = vld [vmem:[#allocation4 + $0x3e8] ss:$16 sps:$4 sm:$0xff]  }
  0x78   :  { %900 = vmatpush1.bf16.msra.mxu0 %v1701_v6  ;;  %982 = vmatpush1.bf16.msra.mxu1 %v1704_v7  ;;  %v62_v6 = vld [vmem:[#allocation2 + $0x10] sm:$0xff]  ;;  %v1797_v7 = vld [vmem:[#allocation6 + $0x40] sm:$0xff]  }
  0x79   :  { %901 = vmatprep.subr.bf16.mxu0 %v1709_v8  ;;  %983 = vmatprep.subr.bf16.mxu1 %v1712_v9  ;;  %v1798_v8 = vld [vmem:[#allocation6 + $0xc0] sm:$0xff]   ;;  %v66_v9 = vpack.c.bf16 %v62_v6, %v62_v6 }
  0x7a   :  { %931 = vmatprep.mubr.bf16.mxu0 %v67_v33  ;;  %1013 = vmatprep.mubr.bf16.mxu1 %v67_v33  ;;  %v1822_v33 = vld [vmem:[#allocation6 + $0xf0] sm:$0xff]  }
  0x7c   :  { %902 = vmatpush1.bf16.msra.mxu0 %v1707_v10  ;;  %984 = vmatpush1.bf16.msra.mxu1 %v1710_v11  ;;  %v1799_v10 = vld [vmem:[#allocation6] sm:$0xff]  }
  0x7d   :  { %903 = vmatprep.subr.bf16.mxu0 %v1715_v12  ;;  %985 = vmatprep.subr.bf16.mxu1 %v1718_v13  ;;  %v1800_v11 = vld [vmem:[#allocation6 + $0x80] sm:$0xff]   ;;  %v1801_v12 = vld [vmem:[#allocation6 + $0x48] sm:$0xff]  }
  0x7e   :  { %v1802_v13 = vld [vmem:[#allocation6 + $0xc8] sm:$0xff]  }
  0x80   :  { %904 = vmatpush1.bf16.msra.mxu0 %v1713_v14  ;;  %986 = vmatpush1.bf16.msra.mxu1 %v1716_v15  ;;  %v1803_v14 = vld [vmem:[#allocation6 + $0x8] sm:$0xff]  }
  0x81   :  { %905 = vmatprep.subr.bf16.mxu0 %v1721_v16  ;;  %987 = vmatprep.subr.bf16.mxu1 %v1724_v17  ;;  %v1804_v15 = vld [vmem:[#allocation6 + $0x88] sm:$0xff]   ;;  %v1805_v16 = vld [vmem:[#allocation6 + $0x50] sm:$0xff]  }
  0x82   :  { %v1806_v17 = vld [vmem:[#allocation6 + $0xd0] sm:$0xff]  }
  0x84   :  { %906 = vmatpush1.bf16.msra.mxu0 %v1719_v18  ;;  %988 = vmatpush1.bf16.msra.mxu1 %v1722_v19  ;;  %v1807_v18 = vld [vmem:[#allocation6 + $0x10] sm:$0xff]  }
  0x85   :  { %907 = vmatprep.subr.bf16.mxu0 %v1727_v20  ;;  %989 = vmatprep.subr.bf16.mxu1 %v1730_v21  ;;  %v1808_v19 = vld [vmem:[#allocation6 + $0x90] sm:$0xff]   ;;  %v1809_v20 = vld [vmem:[#allocation6 + $0x58] sm:$0xff]  }
  0x86   :  { %v1810_v21 = vld [vmem:[#allocation6 + $0xd8] sm:$0xff]  }
  0x88   :  { %908 = vmatpush1.bf16.msra.mxu0 %v1725_v22  ;;  %990 = vmatpush1.bf16.msra.mxu1 %v1728_v23  ;;  %v1811_v22 = vld [vmem:[#allocation6 + $0x18] sm:$0xff]  }
  0x89   :  { %909 = vmatprep.subr.bf16.mxu0 %v1733_v24  ;;  %991 = vmatprep.subr.bf16.mxu1 %v1736_v25  ;;  %v1812_v23 = vld [vmem:[#allocation6 + $0x98] sm:$0xff]   ;;  %v1813_v24 = vld [vmem:[#allocation6 + $0x60] sm:$0xff]  }
  0x8a   :  { %v1814_v25 = vld [vmem:[#allocation6 + $0xe0] sm:$0xff]  }
  0x8c   :  { %910 = vmatpush1.bf16.msra.mxu0 %v1731_v26  ;;  %992 = vmatpush1.bf16.msra.mxu1 %v1734_v27  ;;  %v1815_v26 = vld [vmem:[#allocation6 + $0x20] sm:$0xff]  }
  0x8d   :  { %911 = vmatprep.subr.bf16.mxu0 %v1739_v28  ;;  %993 = vmatprep.subr.bf16.mxu1 %v1742_v29  ;;  %v1816_v27 = vld [vmem:[#allocation6 + $0xa0] sm:$0xff]   ;;  %v1817_v28 = vld [vmem:[#allocation6 + $0x68] sm:$0xff]  }
  0x8e   :  { %v1818_v29 = vld [vmem:[#allocation6 + $0xe8] sm:$0xff]  }
  0x90   :  { %912 = vmatpush1.bf16.msra.mxu0 %v1737_v30  ;;  %994 = vmatpush1.bf16.msra.mxu1 %v1740_v32  ;;  %v1819_v30 = vld [vmem:[#allocation6 + $0x28] sm:$0xff]   ;;  %v1821_v32 = vld [vmem:[#allocation6 + $0x70] sm:$0xff]  }
  0x91   :  { %913 = vmatprep.subr.bf16.mxu0 %v1745_v34  ;;  %995 = vmatprep.subr.bf16.mxu1 %v1748_v35  ;;  %v1823_v34 = vld [vmem:[#allocation6 + $0x30] sm:$0xff]  }
  0x92   :  { %v1824_v35 = vld [vmem:[#allocation6 + $0xb0] sm:$0xff]  }
  0x94   :  { %914 = vmatpush1.bf16.msra.mxu0 %v1743_v36  ;;  %996 = vmatpush1.bf16.msra.mxu1 %v1746_v37  ;;  %v1825_v36 = vld [vmem:[#allocation6 + $0x78] sm:$0xff]  }
  0x95   :  { %915 = vmatprep.subr.bf16.mxu0 %v1751_v38  ;;  %997 = vmatprep.subr.bf16.mxu1 %v1754_v39  ;;  %v1826_v37 = vld [vmem:[#allocation6 + $0xf8] sm:$0xff]  }
  0x96   :  { %v1827_v38 = vld [vmem:[#allocation6 + $0x38] sm:$0xff]  }
  0x97   :  { %v1828_v39 = vld [vmem:[#allocation6 + $0xb8] sm:$0xff]  }
  0x98   :  { %916 = vmatpush1.bf16.msra.mxu0 %v1749_v40  ;;  %998 = vmatpush1.bf16.msra.mxu1 %v1752_v41  ;;  %v198_v40 = vlaneseq }
  0x99   :  { %917 = vmatprep.subr.bf16.mxu0 %v1757_v42  ;;  %999 = vmatprep.subr.bf16.mxu1 %v1760_v43 }
  0x9a   :  { %v199_v41 = vshrl.u32 %v198_v40, 7 }
  0x9c   :  { %918 = vmatpush1.bf16.msra.mxu0 %v1755_v44  ;;  %1000 = vmatpush1.bf16.msra.mxu1 %v1758_v45  ;;  %v200_v42 = vsub.s32 0, %v199_v41  ;;  %v208_v43 = vsub.s32 2, %v199_v41  ;;  %v196_v44 = vld [vmem:[%s1983_s2] sm:$0xf]  ;;  %v204_v45 = vsub.s32 1, %v199_v41 }
  0x9d   :  { %919 = vmatprep.subr.bf16.mxu0 %v1763_v46  ;;  %1001 = vmatprep.subr.bf16.mxu1 %v1766_v47  ;;  %v212_v46 = vsub.s32 3, %v199_v41 }
  0x9e   :  { %v201_v47 = vrot.slane %v196_v44, %v200_v42 }
  0xa0   :  { %920 = vmatpush1.bf16.msra.mxu0 %v1761_v48  ;;  %1002 = vmatpush1.bf16.msra.mxu1 %v1764_v49  ;;  %v209_v48 = vrot.slane %v196_v44, %v208_v43  ;;  %v205_v49 = vrot.slane %v196_v44, %v204_v45 }
  0xa1   :  { %921 = vmatprep.subr.bf16.mxu0 %v1769_v50  ;;  %1003 = vmatprep.subr.bf16.mxu1 %v1772_v51  ;;  %v213_v50 = vrot.slane %v196_v44, %v212_v46 }
  0xa4   :  { %922 = vmatpush1.bf16.msra.mxu0 %v1767_v52  ;;  %1004 = vmatpush1.bf16.msra.mxu1 %v1770_v53 }
  0xa5   :  { %923 = vmatprep.subr.bf16.mxu0 %v1775_v54  ;;  %1005 = vmatprep.subr.bf16.mxu1 %v1778_v55 }
  0xa8   :  { %924 = vmatpush1.bf16.msra.mxu0 %v1773_v56  ;;  %1006 = vmatpush1.bf16.msra.mxu1 %v1776_v57 }
  0xa9   :  { %925 = vmatprep.subr.bf16.mxu0 %v1781_v58  ;;  %1007 = vmatprep.subr.bf16.mxu1 %v1784_v59 }
  0xac   :  { %926 = vmatpush1.bf16.msra.mxu0 %v1779_v60  ;;  %1008 = vmatpush1.bf16.msra.mxu1 %v1782_v61 }
  0xad   :  { %927 = vmatprep.subr.bf16.mxu0 %v1787_v62  ;;  %1009 = vmatprep.subr.bf16.mxu1 %v1790_v63 }
  0xb0   :  { %928 = vmatpush1.bf16.msra.mxu0 %v1785_v0  ;;  %1010 = vmatpush1.bf16.msra.mxu1 %v1788_v1 }
  0xb1   :  { %929 = vmatprep.subr.bf16.mxu0 %v1793_v2  ;;  %1011 = vmatprep.subr.bf16.mxu1 %v1796_v3 }
  0xb4   :  { %930 = vmatpush1.bf16.msra.mxu0 %v1791_v4  ;;  %1012 = vmatpush1.bf16.msra.mxu1 %v1794_v5 }
  0xb5   :  { %1542 = vmatprep.subr.bf16.mxu0 %v1797_v7  ;;  %1564 = vmatprep.subr.bf16.mxu1 %v1798_v8 }
  0xb7   :  { %932 = vmatmul.mubr.bf16.vlgmr.msra.gmra.mrb[0].mxu0 %v66_v9  ;;  %1014 = vmatmul.mubr.bf16.vlgmr.msra.gmra.mrb[0].mxu1 %v66_v9  ;;  %v1509_v9 = vld [vmem:[%s1985_s4] ss:$0 sm:$0xff] }
  0xb8   :  { %1543 = vmatpush3.bf16.msra.mxu0 %v1799_v10  ;;  %1565 = vmatpush3.bf16.msra.mxu1 %v1800_v11 }
  0xb9   :  { %1544 = vmatprep.subr.bf16.mxu0 %v1801_v12  ;;  %1566 = vmatprep.subr.bf16.mxu1 %v1802_v13 }
  0xbc   :  { %1545 = vmatpush3.bf16.msra.mxu0 %v1803_v14  ;;  %1567 = vmatpush3.bf16.msra.mxu1 %v1804_v15 }
  0xbd   :  { %1546 = vmatprep.subr.bf16.mxu0 %v1805_v16  ;;  %1568 = vmatprep.subr.bf16.mxu1 %v1806_v17 }
  0xc0   :  { %1547 = vmatpush3.bf16.msra.mxu0 %v1807_v18  ;;  %1569 = vmatpush3.bf16.msra.mxu1 %v1808_v19 }
  0xc1   :  { %1548 = vmatprep.subr.bf16.mxu0 %v1809_v20  ;;  %1570 = vmatprep.subr.bf16.mxu1 %v1810_v21 }
  0xc4   :  { %1549 = vmatpush3.bf16.msra.mxu0 %v1811_v22  ;;  %1571 = vmatpush3.bf16.msra.mxu1 %v1812_v23 }
  0xc5   :  { %1550 = vmatprep.subr.bf16.mxu0 %v1813_v24  ;;  %1572 = vmatprep.subr.bf16.mxu1 %v1814_v25 }
  0xc8   :  { %1551 = vmatpush3.bf16.msra.mxu0 %v1815_v26  ;;  %1573 = vmatpush3.bf16.msra.mxu1 %v1816_v27 }
  0xc9   :  { %1552 = vmatprep.subr.bf16.mxu0 %v1817_v28  ;;  %1574 = vmatprep.subr.bf16.mxu1 %v1818_v29 }
  0xcc   :  { %1553 = vmatpush3.bf16.msra.mxu0 %v1819_v30  ;;  %1575 = vmatpush3.bf16.msra.mxu1 %v1820_v31 }
  0xcd   :  { %1554 = vmatprep.subr.bf16.mxu0 %v1821_v32  ;;  %1576 = vmatprep.subr.bf16.mxu1 %v1822_v33 }
  0xd0   :  { %1555 = vmatpush3.bf16.msra.mxu0 %v1823_v34  ;;  %1577 = vmatpush3.bf16.msra.mxu1 %v1824_v35 }
  0xd1   :  { %1556 = vmatprep.subr.bf16.mxu0 %v1825_v36  ;;  %1578 = vmatprep.subr.bf16.mxu1 %v1826_v37 }
  0xd4   :  { %1557 = vmatpush3.bf16.msra.mxu0 %v1827_v38  ;;  %1579 = vmatpush3.bf16.msra.mxu1 %v1828_v39 }
 0x18a   :  { %v933_v51 = vpop.f32.mrb[0].mxu0  ;;  %v1015_v52 = vpop.f32.mrb[0].mxu1 }
 0x18b   :  { %v1586_v53 = vadd.f32 %v933_v51, %v201_v47  ;;  %v1588_v54 = vadd.f32 %v1015_v52, %v209_v48  ;;  %v935_v55 = vpop.f32.mrb[1].mxu0  ;;  %v1017_v56 = vpop.f32.mrb[1].mxu1 }
 0x18c   :  { %v1587_v57 = vadd.f32 %v935_v55, %v205_v49  ;;  %v1589_v58 = vadd.f32 %v1017_v56, %v213_v50  ;;  %v937_v59 = vpop.f32.mrb[2].mxu0  ;;  %v1019_v60 = vpop.f32.mrb[2].mxu1 }
 0x18d   :  { %v1022_v61 = vmax.f32 %v1586_v53, 0.0  ;;  %v1024_v62 = vmax.f32 %v1588_v54, 0.0  ;;  %v938_v63 = vpop.f32.mrb[3].mxu0  ;;  %v1020_v0 = vpop.f32.mrb[3].mxu1 }
 0x18e   :  { %v1023_v1 = vmax.f32 %v1587_v57, 0.0  ;;  %v1025_v2 = vmax.f32 %v1589_v58, 0.0 }
 0x18f   :  { %v1026_v5 = vpack.c.bf16 %v1022_v61, %v1022_v61  ;;  %v1028_v6 = vpack.c.bf16 %v1024_v62, %v1024_v62 }
 0x190   :  { %v1027_v3 = vpack.c.bf16 %v1023_v1, %v1023_v1  ;;  %v1029_v4 = vpack.c.bf16 %v1025_v2, %v1025_v2 }
 0x192   :  { %1325 = vmatprep.mubr.bf16.mxu0 %v1027_v3  ;;  %1365 = vmatprep.mubr.bf16.mxu1 %v1029_v4 }
 0x193   :  { %1326 = vmatmul.mubr.bf16.vlgmr.msra.gmra.mrb[4].mxu0 %v1026_v5  ;;  %1366 = vmatmul.mubr.bf16.vlgmr.msra.gmra.mrb[4].mxu1 %v1028_v6 }
 0x266   :  { %v1558_v7 = vpop.f32.mrb[4].mxu0  ;;  %v1580_v8 = vpop.f32.mrb[4].mxu1 }
 0x267   :  { %v1559_v10 = vpop.f32.mrb[5].mxu0  ;;  %v1581_v11 = vpop.f32.mrb[5].mxu1 }
 0x268   :  { %v1560_v12 = vadd.f32 %v1559_v10, %v1558_v7  ;;  %v1582_v13 = vadd.f32 %v1581_v11, %v1580_v8  ;;  %v1561_v14 = vpop.f32.mrb[6].mxu0  ;;  %v1583_v15 = vpop.f32.mrb[6].mxu1 }
 0x269   :  { %v1562_v16 = vpop.f32.mrb[7].mxu0  ;;  %v1584_v17 = vpop.f32.mrb[7].mxu1 }
 0x26a   :  { %v1328_v18 = vadd.f32 %v1560_v12, %v1509_v9 }
 0x26c   :  { %v1368_v19 = vadd.f32 %v1582_v13, %v1328_v18 }
 0x26e   :  { %v1373_v20 = vpack.c.bf16 %v1368_v19, %v1368_v19 }
 0x270   :  { %1374 = vst [vmem:[%s1986_s5] sm:$0xf] %v1373_v20 }
 0x271   :  { %1379 = vsyncpa [#allocation3], 1 }
 0x272   :  { %1380 = vsyncpa [#allocation5], 1 }

</bundles_post_ra>
